<compile_context>
chip_gen: v6e
topology: v6e:2x2x1
jax: 0.10.0
libtpu: 0.0.40
codegen_flags: <defaults>
</compile_context>

<pallas_src>
import math

import jax
import jax.numpy as jnp
from jax import lax
from jax.experimental import pallas as pl
from jax.experimental.pallas import tpu as pltpu


def _round_up(v: int, m: int) -> int:
    return (v + m - 1) // m * m


def _pick_tile_b(b8: int, cap: int) -> int:
    """Largest multiple-of-8 divisor of b8 that is <= cap (b8 is a multiple of 8)."""
    best = 8
    t = 8
    while t <= min(b8, cap):
        if b8 % t == 0:
            best = t
        t += 8
    return best


def _sigmoid_f32(z):
    # Numerically stable sigmoid: exp only sees non-positive args;
    # the divide is pushed to the EUP via an approximate reciprocal.
    e = jnp.exp(-jnp.abs(z))
    inv = pl.reciprocal(1.0 + e, approx=True)
    return jnp.where(z >= 0.0, inv, e * inv)


def _logreg_kernel_single(x_ref, w_ref, b_ref, o_ref):
    """Single K step: whole (padded) D axis in one tile, weight resident in VMEM.

    x_ref: (TILE_B, D_PAD)  input tile
    w_ref: (O, D_PAD)       full weight (PyTorch (O, D) layout, no transpose)
    b_ref: (1, O)           bias (f32)
    o_ref: (TILE_B, O)      f32 output tile
    """
    z = lax.dot_general(
        x_ref[...],
        w_ref[...],
        dimension_numbers=(((1,), (1,)), ((), ())),   # contract lane-dense D on both
        preferred_element_type=jnp.float32,
    ) + b_ref[...]
    o_ref[...] = _sigmoid_f32(z)


def _logreg_kernel_ktiled(x_ref, w_ref, b_ref, o_ref):
    """K-tiled reduction: accumulate directly into the resident output block.

    o_ref's block index is (i, 0) for every k, so it stays resident across the
    reduction axis; no VMEM scratch accumulator is needed.
    """
    k = pl.program_id(1)

    @pl.when(k == 0)
    def _():
        o_ref[...] = jnp.zeros_like(o_ref)

    o_ref[...] += lax.dot_general(
        x_ref[...],
        w_ref[...],
        dimension_numbers=(((1,), (1,)), ((), ())),
        preferred_element_type=jnp.float32,
    )

    @pl.when(k == pl.num_programs(1) - 1)
    def _():
        o_ref[...] = _sigmoid_f32(o_ref[...] + b_ref[...])


def logistic_regression_forward(x, weight, bias, *, tile_b_max=256, tile_k_max=8192):
    """sigmoid(flatten(x) @ weight.T + bias).

    x:      (B, ...)  flattened from dim 1 (torch.nn.Flatten(start_dim=1))
    weight: (O, D)    PyTorch nn.Linear layout (kept untransposed)
    bias:   (O,)
    Returns (B, O) float32.
    """
    B = x.shape[0]
    D = math.prod(x.shape[1:])
    O = weight.shape[0]
    assert weight.shape == (O, D)

    # Stream bf16 when both operands are bf16 (halves HBM traffic); else f32.
    if x.dtype == jnp.bfloat16 and weight.dtype == jnp.bfloat16:
        stream_dtype = jnp.bfloat16
    else:
        stream_dtype = jnp.float32
    itemsize = jnp.dtype(stream_dtype).itemsize

    x2 = x.reshape(B, D).astype(stream_dtype)      # Flatten(start_dim=1)
    w = weight.astype(stream_dtype)                 # (O, D) — no host transpose
    b2 = bias.reshape(1, O).astype(jnp.float32)

    # ---- Batch tiling: pad only to a multiple of 8 rows; tile divides b8 exactly.
    b8 = _round_up(max(B, 1), 8)
    tile_b = _pick_tile_b(b8, tile_b_max)
    if b8 // tile_b == 1 and b8 >= 16:
        # Ensure >= 2 "parallel" batch tiles so both v7x TensorCores get work.
        tile_b = _pick_tile_b(b8, b8 // 2)
    grid_b = b8 // tile_b

    # ---- Contraction (D) tiling: pad D only to a lane multiple, then split the
    # K axis evenly so any extra padding is < 128 * grid_k columns.
    d_lane = _round_up(D, 128)
    if d_lane <= tile_k_max:
        grid_k = 1
        tile_k = d_lane
    else:
        grid_k = pl.cdiv(d_lane, tile_k_max)
        tile_k = _round_up(pl.cdiv(d_lane, grid_k), 128)
    d_pad = tile_k * grid_k

    pad_rows = b8 - B
    pad_cols = d_pad - D   # zero padding is exact for the dot product
    xp = jnp.pad(x2, ((0, pad_rows), (0, pad_cols))) if (pad_rows or pad_cols) else x2
    wp = jnp.pad(w, ((0, 0), (0, pad_cols))) if pad_cols else w

    # VMEM budget from the actual double-buffered footprint (under v7x's 64 MiB).
    footprint = (
        2 * tile_b * tile_k * itemsize     # x tiles (double buffered)
        + 2 * O * tile_k * itemsize        # weight tiles
        + 2 * tile_b * O * 4               # output tiles
        + 2 * O * 4                        # bias
    )
    vmem_limit = min(48 * 1024 * 1024, max(32 * 1024 * 1024, int(footprint * 1.75)))

    if grid_k == 1:
        out_padded = pl.pallas_call(
            _logreg_kernel_single,
            out_shape=jax.ShapeDtypeStruct((b8, O), jnp.float32),
            grid=(grid_b,),
            in_specs=[
                pl.BlockSpec((tile_b, tile_k), lambda i: (i, 0)),
                pl.BlockSpec((O, tile_k), lambda i: (0, 0)),
                pl.BlockSpec((1, O), lambda i: (0, 0)),
            ],
            out_specs=pl.BlockSpec((tile_b, O), lambda i: (i, 0)),
            compiler_params=pltpu.CompilerParams(
                dimension_semantics=("parallel",),
                vmem_limit_bytes=vmem_limit,
            ),
        )(xp, wp, b2)
    else:
        out_padded = pl.pallas_call(
            _logreg_kernel_ktiled,
            out_shape=jax.ShapeDtypeStruct((b8, O), jnp.float32),
            grid=(grid_b, grid_k),
            in_specs=[
                pl.BlockSpec((tile_b, tile_k), lambda i, k: (i, k)),
                pl.BlockSpec((O, tile_k), lambda i, k: (0, k)),
                pl.BlockSpec((1, O), lambda i, k: (0, 0)),
            ],
            out_specs=pl.BlockSpec((tile_b, O), lambda i, k: (i, 0)),
            compiler_params=pltpu.CompilerParams(
                dimension_semantics=("parallel", "arbitrary"),
                vmem_limit_bytes=vmem_limit,
            ),
        )(xp, wp, b2)

    return out_padded[:B, :]


if __name__ == "__main__":
    # Small shapes consistent with the module: image-like input flattened to D.
    B, C, H, W = 2, 4, 16, 16
    D = C * H * W          # input_dim = 1024
    O = 8                  # output_dim

    key = jax.random.PRNGKey(0)
    kx, kw, kb = jax.random.split(key, 3)

    x = jax.random.normal(kx, (B, C, H, W), dtype=jnp.float32)
    # Deterministic init mimicking nn.Linear default (uniform in +/- 1/sqrt(D)).
    bound = 1.0 / math.sqrt(float(D))
    weight = jax.random.uniform(kw, (O, D), minval=-bound, maxval=bound,
                                dtype=jnp.float32)
    bias = jax.random.uniform(kb, (O,), minval=-bound, maxval=bound,
                              dtype=jnp.float32)

    ref = jax.nn.sigmoid(x.reshape(B, D) @ weight.T + bias)

    # Path 1: single-K-step kernel (D fits one tile, weight resident in VMEM).
    out = logistic_regression_forward(x, weight, bias)
    jax.block_until_ready(out)
    assert out.shape == (B, O)
    assert jnp.allclose(out, ref, atol=2e-3, rtol=2e-3), \
        float(jnp.max(jnp.abs(out - ref)))

    # Path 2: K-tiled reduction kernel (force small tile_k to exercise it).
    out2 = logistic_regression_forward(x, weight, bias, tile_k_max=256)
    jax.block_until_ready(out2)
    assert jnp.allclose(out2, ref, atol=2e-3, rtol=2e-3), \
        float(jnp.max(jnp.abs(out2 - ref)))

    print("KERNEL_OK")
</pallas_src>

<mosaic_0001>
module attributes {stable_mosaic.version = 11 : i64} {
  func.func @_logreg_kernel_single(%arg0: i32, %arg1: memref<8x1024xf32, #tpu.memory_space<vmem>>, %arg2: memref<8x1024xf32, #tpu.memory_space<vmem>>, %arg3: memref<1x8xf32, #tpu.memory_space<vmem>>, %arg4: memref<8x8xf32, #tpu.memory_space<vmem>>) attributes {dimension_semantics = [#tpu.dimension_semantics<parallel>], iteration_bounds = array<i64: 1>, scalar_prefetch = 0 : i64, scratch_operands = 0 : i64, tpu.core_type = #tpu.core_type<tc>, window_params = [{transform_indices = @transform_0, window_bounds = array<i64: 8, 1024>}, {pipeline_mode = #tpu.pipeline_mode<synchronous>, transform_indices = @transform_1, window_bounds = array<i64: 8, 1024>}, {pipeline_mode = #tpu.pipeline_mode<synchronous>, transform_indices = @transform_2, window_bounds = array<i64: 1, 8>}, {transform_indices = @transform_3, window_bounds = array<i64: 8, 8>}]} {
    %c0 = arith.constant 0 : index
    %c0_0 = arith.constant 0 : index
    %0 = vector.load %arg1[%c0, %c0_0] : memref<8x1024xf32, #tpu.memory_space<vmem>>, vector<8x1024xf32>
    %c0_1 = arith.constant 0 : index
    %c0_2 = arith.constant 0 : index
    %1 = vector.load %arg2[%c0_1, %c0_2] : memref<8x1024xf32, #tpu.memory_space<vmem>>, vector<8x1024xf32>
    %cst = arith.constant dense<0.000000e+00> : vector<8x8xf32>
    %2 = tpu.matmul %0, %1, %cst {dimension_numbers = #tpu.dot_dimension_numbers<[1], [1], [0], [0], [0, 0, 1, 0], [], []>} : vector<8x1024xf32>, vector<8x1024xf32>, vector<8x8xf32> -> vector<8x8xf32>
    %c0_3 = arith.constant 0 : index
    %c0_4 = arith.constant 0 : index
    %3 = vector.load %arg3[%c0_3, %c0_4] : memref<1x8xf32, #tpu.memory_space<vmem>>, vector<1x8xf32>
    %4 = vector.broadcast %3 : vector<1x8xf32> to vector<8x8xf32>
    %5 = arith.addf %2, %4 : vector<8x8xf32>
    %6 = math.absf %5 : vector<8x8xf32>
    %cst_5 = arith.constant 0.000000e+00 : f32
    %7 = vector.broadcast %cst_5 : f32 to vector<8x8xf32>
    %8 = arith.subf %7, %6 : vector<8x8xf32>
    %9 = math.exp %8 : vector<8x8xf32>
    %cst_6 = arith.constant 1.000000e+00 : f32
    %10 = vector.broadcast %cst_6 : f32 to vector<8x8xf32>
    %11 = arith.addf %10, %9 : vector<8x8xf32>
    %12 = tpu.reciprocal %11 {approx = true} : vector<8x8xf32> -> vector<8x8xf32>
    %cst_7 = arith.constant 0.000000e+00 : f32
    %13 = vector.broadcast %cst_7 : f32 to vector<8x8xf32>
    %14 = arith.cmpf oge, %5, %13 : vector<8x8xf32>
    %15 = arith.mulf %9, %12 : vector<8x8xf32>
    %16 = arith.select %14, %12, %15 : vector<8x8xi1>, vector<8x8xf32>
    %c0_8 = arith.constant 0 : index
    %c0_9 = arith.constant 0 : index
    %17 = vector.load %arg4[%c0_8, %c0_9] : memref<8x8xf32, #tpu.memory_space<vmem>>, vector<8x8xf32>
    tpu.vector_store %arg4[%c0_8, %c0_9], %16 {strides = array<i32>} : memref<8x8xf32, #tpu.memory_space<vmem>>, vector<8x8xf32>,
    return
  }
  func.func @transform_0(%arg0: i32) -> (i32, i32) {
    %c0_i32 = arith.constant 0 : i32
    %c0_i32_0 = arith.constant 0 : i32
    return %arg0, %c0_i32 : i32, i32
  }
  func.func @transform_1(%arg0: i32) -> (i32, i32) {
    %c0_i32 = arith.constant 0 : i32
    %c0_i32_0 = arith.constant 0 : i32
    %c0_i32_1 = arith.constant 0 : i32
    return %c0_i32, %c0_i32_0 : i32, i32
  }
  func.func @transform_2(%arg0: i32) -> (i32, i32) {
    %c0_i32 = arith.constant 0 : i32
    %c0_i32_0 = arith.constant 0 : i32
    %c0_i32_1 = arith.constant 0 : i32
    return %c0_i32, %c0_i32_0 : i32, i32
  }
  func.func @transform_3(%arg0: i32) -> (i32, i32) {
    %c0_i32 = arith.constant 0 : i32
    %c0_i32_0 = arith.constant 0 : i32
    return %arg0, %c0_i32 : i32, i32
  }
}

</mosaic_0001>

<bundles_post_ra>
// kernel: tpu_custom_call.1
= control target key start
LH: loop header
LB: loop body
LE: loop exit
PB: predicated region body
PF: predicated region fallthrough
CT: control target
= control target key end

     0   :  { %8 = vsyncpa [#allocation3], 0  ;;  %s478_s0 = inlined_call_operand.hbm [shape: f32[8,1024], index: 0, kind: input, shape index: {}]   ;;  %s479_s1 = inlined_call_operand.hbm [shape: f32[8,1024], index: 1, kind: input, shape index: {}]   ;;  %s480_s2 = inlined_call_operand.vmem [shape: f32[1,8], index: 2, kind: input, shape index: {}]   ;;  %s481_s3 = inlined_call_operand.hbm [shape: f32[8,8], index: 3, kind: output, shape index: {}]  }
   0x1   :  { %9 = vsyncpa [#allocation6], 0 }
   0x2   :  { %10 = vsyncpa [#allocation4], 0  ;;  %s443_s12 = smov [#allocation2]   ;;  %s444_s14 = smov [#allocation5]  }
   0x3   :  { %s17_s13 = sshll.u32 %s443_s12, 4  ;;  %s27_s15 = sshll.u32 %s444_s14, 4  ;;  %s18_s13 = int_to_ptr.vmem [resolvable:$true] %s17_s13  ;;  %s28_s15 = int_to_ptr.vmem [resolvable:$true] %s27_s15 }
   0x4   :  { %s385_s16 = scalar_lea.vmem %s18_s13, 1024  ;;  %p390_p1 = scmp.lt.s32.totalorder %s18_s13, %s18_s13 }
   0x5   :  { %p386_p0 = scmp.ne.s32.totalorder %s18_s13, %s385_s16  ;;  %p391_p2 = scmp.lt.s32.totalorder %s385_s16, %s385_s16 }
   0x7   :  { %p392_p3 = por %p391_p2, %p390_p1 }
   0x9   :  { %p393_p4 = pnand %p392_p3, %p386_p0 }
   0xb   :  { %396 = shalt.err (!%p393_p4)
}
   0xc   :  { %20 = dma.hbm_to_vmem [thread:$0]  %s478_s0, 1024, %s18_s13, [#allocation3]  }
   0xd   :  { %s405_s19 = scalar_lea.vmem %s28_s15, 1024  ;;  %p410_p6 = scmp.lt.s32.totalorder %s28_s15, %s28_s15 }
   0xe   :  { %p406_p5 = scmp.ne.s32.totalorder %s28_s15, %s405_s19  ;;  %p411_p7 = scmp.lt.s32.totalorder %s405_s19, %s405_s19 }
  0x10   :  { %p412_p8 = por %p411_p7, %p410_p6 }
  0x12   :  { %p413_p9 = pnand %p412_p8, %p406_p5 }
  0x14   :  { %416 = shalt.err (!%p413_p9)
}
  0x15   :  { %30 = dma.hbm_to_vmem [thread:$0]  %s479_s1, 1024, %s28_s15, [#allocation6]  }
  0x16   :  { %437 = dma.done.wait [#allocation3], 1024  }
  0x17   :  { %438 = vsyncadd [#allocation3], 4294966272 }
  0x18   :  { %439 = dma.done.wait [#allocation6], 1024  }
  0x19   :  { %440 = vsyncadd [#allocation6], 4294966272  ;;  %v48_v0 = vld [vmem:[#allocation5 + $0x8] sm:$0xff]  ;;  %v47_v1 = vld [vmem:[#allocation5] sm:$0xff]  ;;  %vm351_vm0 = vcmask 64512  }
  0x1a   :  { %v50_v2 = vld [vmem:[#allocation5 + $0x18] sm:$0xff]  ;;  %92 = vmatprep.subr.mxu0 %v48_v0  ;;  %v49_v3 = vld [vmem:[#allocation5 + $0x10] sm:$0xff]  ;;  %v40_v4 = vld [vmem:[#allocation2 + $0x8] sm:$0xff] }
  0x1b   :  { %162 = vmatprep.subr.mxu1 %v50_v2  ;;  %v39_v5 = vld [vmem:[#allocation2] sm:$0xff]  ;;  %93 = vmatpush1.xpose.msra.mxu0 %v47_v1  ;;  %v42_v6 = vld [vmem:[#allocation2 + $0x18] sm:$0xff]  ;;  %v52_v7 = vld [vmem:[#allocation5 + $0x28] sm:$0xff] }
  0x1c   :  { %163 = vmatpush1.xpose.msra.mxu1 %v49_v3  ;;  %v41_v8 = vld [vmem:[#allocation2 + $0x10] sm:$0xff]  ;;  %126 = vmatprep.mubr.f32.mxu0 %v40_v4  ;;  %v51_v9 = vld [vmem:[#allocation5 + $0x20] sm:$0xff]  ;;  %v54_v10 = vld [vmem:[#allocation5 + $0x38] sm:$0xff] }
  0x1d   :  { %196 = vmatprep.mubr.f32.mxu1 %v42_v6  ;;  %v53_v11 = vld [vmem:[#allocation5 + $0x30] sm:$0xff]  ;;  %232 = vmatprep.subr.mxu0 %v52_v7  ;;  %v44_v12 = vld [vmem:[#allocation2 + $0x28] sm:$0xff]  ;;  %v46_v13 = vld [vmem:[#allocation2 + $0x38] sm:$0xff] }
  0x1e   :  { %302 = vmatprep.subr.mxu1 %v54_v10  ;;  %127 = vmatmul.mubr.f32.vlgmr.msra.gmra.mxu0 %v39_v5  ;;  %v43_v14 = vld [vmem:[#allocation2 + $0x20] sm:$0xff]  ;;  %v45_v15 = vld [vmem:[#allocation2 + $0x30] sm:$0xff] }
  0x1f   :  { %197 = vmatmul.mubr.f32.vlgmr.msra.gmra.mxu1 %v41_v8  ;;  %233 = vmatpush1.xpose.msra.mxu0 %v51_v9  ;;  %v369_v16 = vld [vmem:[%s480_s2] ss:$0 sm:$0xff]  ;;  %s445_s2 = smov [#allocation7]  }
  0x20   :  { %303 = vmatpush1.xpose.msra.mxu1 %v53_v11  ;;  %266 = vmatprep.mubr.f32.mxu0 %v44_v12  ;;  %s359_s22 = sshll.u32 %s445_s2, 4  ;;  %s360_s22 = int_to_ptr.vmem [resolvable:$true] %s359_s22 }
  0x21   :  { %336 = vmatprep.mubr.f32.mxu1 %v46_v13  ;;  %s417_s23 = scalar_lea.vmem %s360_s22, 128  ;;  %p422_p11 = scmp.lt.s32.totalorder %s360_s22, %s360_s22 }
  0x22   :  { %267 = vmatmul.mubr.f32.vlgmr.msra.gmra.mxu0 %v43_v14  ;;  %p418_p10 = scmp.ne.s32.totalorder %s360_s22, %s417_s23  ;;  %p423_p12 = scmp.lt.s32.totalorder %s417_s23, %s417_s23 }
  0x23   :  { %337 = vmatmul.mubr.f32.vlgmr.msra.gmra.mxu1 %v45_v15 }
  0x24   :  { %p424_p13 = por %p423_p12, %p422_p11 }
  0x26   :  { %p425_p0 = pnand %p424_p13, %p418_p10 }
  0xde   :  { %v128_v17 = vpop.f32.mrf.mxu0 }
  0xdf   :  { %v198_v18 = vpop.f32.mrf.mxu1  ;;  %v129_v19 = vadd.f32 %v369_v16, %v128_v17 }
  0xe0   :  { %v130_v20 = vpop.f32.mrf.mxu0 }
  0xe1   :  { %v200_v21 = vpop.f32.mrf.mxu1  ;;  %v199_v22 = vadd.f32 %v198_v18, %v129_v19 }
  0xe2   :  { %v268_v23 = vpop.f32.mrf.mxu0 }
  0xe3   :  { %v338_v24 = vpop.f32.mrf.mxu1  ;;  %v269_v25 = vadd.f32 %v268_v23, %v199_v22 }
  0xe4   :  { %v270_v26 = vpop.f32.mrf.mxu0 }
  0xe5   :  { %v340_v27 = vpop.f32.mrf.mxu1  ;;  %v339_v28 = vadd.f32 %v338_v24, %v269_v25 }
  0xe7   :  { %v342_v29 = vand.u32 2147483647, %v339_v28  ;;  %vm348_vm1 = vcmp.ge.f32.partialorder %v339_v28, 0.0 }
  0xe9   :  { %v343_v30 = vsub.f32 0.0, %v342_v29 }
  0xeb   :  { %v344_v31 = vmul.f32 1.442695, %v343_v30 }
  0xed   :  { %373 = vpow2.f32 %v344_v31 }
  0xfa   :  { %v374_v32 = vpop.eup %373 }
  0xfb   :  { %v346_v33 = vadd.f32 1.0, %v374_v32 }
  0xfd   :  { %375 = vrcp.f32 %v346_v33 }
 0x10a   :  { %v376_v34 = vpop.eup %375 }
 0x10b   :  { %v349_v35 = vmul.f32 %v376_v34, %v374_v32 }
 0x10d   :  { %v350_v36 = vsel %vm348_vm1, %v376_v34, %v349_v35 }
 0x10e   :  { %352 = vst.msk [vmem:[#allocation7] sm:$0xff] %vm351_vm0, %v350_v36 }
 0x10f   :  { %428 = shalt.err (!%p425_p0)
}
 0x110   :  { %362 = dma.vmem_to_hbm [thread:$0]  %s360_s22, 128, %s481_s3, [#allocation4]  }
 0x111   :  { %441 = dma.done.wait [#allocation4], 128  }
 0x112   :  { %442 = vsyncadd [#allocation4], 4294967168 }
 0x113   :  { %366 = vsyncpa [#allocation3], 1 }
 0x114   :  { %367 = vsyncpa [#allocation6], 1 }
 0x115   :  { %368 = vsyncpa [#allocation4], 1 }

</bundles_post_ra>
